<compile_context>
chip_gen: v7x
topology: tpu7x:2x2x1
jax: 0.10.0
libtpu: 0.0.40
codegen_flags: <defaults>
</compile_context>

<pallas_src>
import jax
import jax.numpy as jnp
from jax.experimental import pallas as pl
from jax.experimental.pallas import tpu as pltpu

# ---- small config consistent with the module structure ----
VOCAB = 100
MAX_POS = 16
TYPE_VOCAB = 2
HIDDEN = 32          # stands in for 768
N_HEADS = 4
HEAD_DIM = HIDDEN // N_HEADS
INTERMEDIATE = 64
N_LAYERS = 2
LN_EPS = 1e-12


def _layernorm(x, g, b):
    mean = jnp.mean(x, axis=-1, keepdims=True)
    var = jnp.mean(jnp.square(x - mean), axis=-1, keepdims=True)
    return (x - mean) * jax.lax.rsqrt(var + LN_EPS) * g + b


# ---------------- fused encoder kernel ----------------
# grid = (batch_chunk, layer, row_in_chunk)
#   axis 0 "parallel"  : megacore / v7x shards batch chunks across cores
#   axis 1 "arbitrary" : layers, sequential; x carried in VMEM scratch
#   axis 2 "arbitrary" : batch rows inside a chunk (weights stay resident)

def bert_fused_kernel(emb_ref, bias_ref, emb_g_ref, emb_b_ref,
                      wqkv_ref, bqkv_ref, wo_ref, bo_ref,
                      ln1_g_ref, ln1_b_ref, w1_ref, b1_ref,
                      w2_ref, b2_ref, ln2_g_ref, ln2_b_ref,
                      pooled_ref, x_scratch):
    layer = pl.program_id(1)
    row = pl.program_id(2)                       # batch row within this chunk

    # ---- embedding layernorm once per row (first layer step) ----
    @pl.when(layer == 0)
    def _():
        x_scratch[row] = _layernorm(emb_ref[...].astype(jnp.float32),
                                    emb_g_ref[...], emb_b_ref[...])

    x = x_scratch[row]                           # [S, H] f32, VMEM-resident

    # ---- fused QKV projection: bf16 MXU operands, f32 accumulation ----
    qkv = (jnp.dot(x.astype(jnp.bfloat16), wqkv_ref[...],
                   preferred_element_type=jnp.float32)
           + bqkv_ref[...])                      # [S, 3H] f32

    # ---- head-major layout [NH, S, dh]; batched attention einsums ----
    def heads(block):                            # [S, H] f32 -> [NH, S, dh] bf16
        return jnp.stack(
            [block[:, h * HEAD_DIM:(h + 1) * HEAD_DIM] for h in range(N_HEADS)],
            axis=0).astype(jnp.bfloat16)

    qh = heads(qkv[:, 0:HIDDEN])
    kh = heads(qkv[:, HIDDEN:2 * HIDDEN])
    vh = heads(qkv[:, 2 * HIDDEN:3 * HIDDEN])

    # scores, mask add and softmax all in f32
    s = jnp.einsum('hqd,hkd->hqk', qh, kh,
                   preferred_element_type=jnp.float32)       # [NH, S, S]
    s = s + bias_ref[...][None, :, :]                        # additive mask
    m = jnp.max(s, axis=-1, keepdims=True)
    p = jnp.exp(s - m)
    p = p * pl.reciprocal(jnp.sum(p, axis=-1, keepdims=True), approx=True)

    ctx = jnp.einsum('hqk,hkd->hqd', p.astype(jnp.bfloat16), vh,
                     preferred_element_type=jnp.float32)     # [NH, S, dh] f32
    # concat heads along lanes -> ONE full-K output projection
    ctx2d = jnp.concatenate([ctx[h] for h in range(N_HEADS)], axis=-1)  # [S, H]
    attn = (jnp.dot(ctx2d.astype(jnp.bfloat16), wo_ref[...],
                    preferred_element_type=jnp.float32) + bo_ref[...])

    # ---- residual + layernorm (fused, f32) ----
    x = _layernorm(x + attn, ln1_g_ref[...], ln1_b_ref[...])

    # ---- FFN (bf16 matmuls, f32 elementwise) ----
    h1 = (jnp.dot(x.astype(jnp.bfloat16), w1_ref[...],
                  preferred_element_type=jnp.float32) + b1_ref[...])
    # TODO(synk): BERT uses exact erf-GELU; tanh-approx GELU used here (EUP tanh path).
    h1 = jax.nn.gelu(h1, approximate=True)
    ff = (jnp.dot(h1.astype(jnp.bfloat16), w2_ref[...],
                  preferred_element_type=jnp.float32) + b2_ref[...])
    x = _layernorm(x + ff, ln2_g_ref[...], ln2_b_ref[...])
    x_scratch[row] = x

    # ---- mean/max pool over all S positions (matches torch.mean/max(dim=1),
    # including padded tokens).  Written every layer step (cheap); the
    # last-layer write is the one that lands in HBM.  Lane-dense [1, 2H]
    # output; Linear(2H, 1) + dropout-identity run in the wrapper.
    apool = jnp.mean(x, axis=0, keepdims=True)               # [1, H]
    mpool = jnp.max(x, axis=0, keepdims=True)                # [1, H]
    pooled_ref[...] = jnp.concatenate([apool, mpool],
                                      axis=-1).astype(pooled_ref.dtype)


# ---------------- parameters ----------------

def init_params(key):
    def nrm(k, shape):
        return 0.02 * jax.random.normal(k, shape, jnp.float32)

    keys = jax.random.split(key, 10)
    scale = 1.0 / (HEAD_DIM ** 0.5)
    wq = nrm(keys[0], (N_LAYERS, HIDDEN, HIDDEN))
    wk = nrm(keys[1], (N_LAYERS, HIDDEN, HIDDEN))
    wv = nrm(keys[2], (N_LAYERS, HIDDEN, HIDDEN))
    return dict(
        word_emb=nrm(keys[3], (VOCAB, HIDDEN)),
        pos_emb=nrm(keys[4], (MAX_POS, HIDDEN)),
        type_emb=nrm(keys[5], (TYPE_VOCAB, HIDDEN)),
        emb_ln_g=jnp.ones((1, HIDDEN), jnp.float32),
        emb_ln_b=jnp.zeros((1, HIDDEN), jnp.float32),
        # fused QKV weight; attention scale folded into Q; bf16 in HBM
        wqkv=jnp.concatenate([wq * scale, wk, wv], axis=-1).astype(jnp.bfloat16),
        bqkv=jnp.zeros((N_LAYERS, 1, 3 * HIDDEN), jnp.float32),
        wo=nrm(keys[6], (N_LAYERS, HIDDEN, HIDDEN)).astype(jnp.bfloat16),
        bo=jnp.zeros((N_LAYERS, 1, HIDDEN), jnp.float32),
        ln1_g=jnp.ones((N_LAYERS, 1, HIDDEN), jnp.float32),
        ln1_b=jnp.zeros((N_LAYERS, 1, HIDDEN), jnp.float32),
        w1=nrm(keys[7], (N_LAYERS, HIDDEN, INTERMEDIATE)).astype(jnp.bfloat16),
        b1=jnp.zeros((N_LAYERS, 1, INTERMEDIATE), jnp.float32),
        w2=nrm(keys[8], (N_LAYERS, INTERMEDIATE, HIDDEN)).astype(jnp.bfloat16),
        b2=jnp.zeros((N_LAYERS, 1, HIDDEN), jnp.float32),
        ln2_g=jnp.ones((N_LAYERS, 1, HIDDEN), jnp.float32),
        ln2_b=jnp.zeros((N_LAYERS, 1, HIDDEN), jnp.float32),
        # nn.Linear(768*2, 1) analogue, applied in the wrapper on the kernel's
        # lane-dense pooled [B, 2H] output.
        out_w=nrm(keys[9], (2 * HIDDEN, 1)),
        out_b=jnp.zeros((1,), jnp.float32),
    )


# ---------------- forward ----------------

def bert_base_multi_uncased_forward(params, ids, mask, token_type_ids):
    B, S = ids.shape
    # Embedding gathers are XLA glue; everything downstream runs in ONE fused
    # Pallas kernel.
    emb = (params['word_emb'][ids]
           + params['pos_emb'][jnp.arange(S)][None, :, :]
           + params['type_emb'][token_type_ids])                        # [B, S, H]
    # Extended attention mask as a tiny additive bias [B, 1, S].
    mask_bias = ((1.0 - mask.astype(jnp.float32)) * -10000.0)[:, None, :]

    # grid = (batch-chunk [parallel], layer, row-in-chunk): layer-outer w.r.t.
    # rows keeps per-layer weight blocks resident across the chunk's rows.
    NB = 2 if B % 2 == 0 else 1          # megacore-friendly batch split
    BI = B // NB

    wmap = lambda c, l, i: (l, 0, 0)              # stacked per-layer weights
    bmap = lambda c, l, i: (c * BI + i, 0, 0)     # per-batch-row blocks
    smap = lambda c, l, i: (0, 0)                 # shared 2-D params

    in_specs = [
        pl.BlockSpec((None, S, HIDDEN), bmap),              # emb
        pl.BlockSpec((None, 1, S), bmap),                   # mask bias
        pl.BlockSpec((1, HIDDEN), smap),                    # emb_ln_g
        pl.BlockSpec((1, HIDDEN), smap),                    # emb_ln_b
        pl.BlockSpec((None, HIDDEN, 3 * HIDDEN), wmap),     # wqkv (bf16)
        pl.BlockSpec((None, 1, 3 * HIDDEN), wmap),          # bqkv
        pl.BlockSpec((None, HIDDEN, HIDDEN), wmap),         # wo (bf16)
        pl.BlockSpec((None, 1, HIDDEN), wmap),              # bo
        pl.BlockSpec((None, 1, HIDDEN), wmap),              # ln1_g
        pl.BlockSpec((None, 1, HIDDEN), wmap),              # ln1_b
        pl.BlockSpec((None, HIDDEN, INTERMEDIATE), wmap),   # w1 (bf16)
        pl.BlockSpec((None, 1, INTERMEDIATE), wmap),        # b1
        pl.BlockSpec((None, INTERMEDIATE, HIDDEN), wmap),   # w2 (bf16)
        pl.BlockSpec((None, 1, HIDDEN), wmap),              # b2
        pl.BlockSpec((None, 1, HIDDEN), wmap),              # ln2_g
        pl.BlockSpec((None, 1, HIDDEN), wmap),              # ln2_b
    ]

    grid_spec = pltpu.PrefetchScalarGridSpec(
        num_scalar_prefetch=0,
        grid=(NB, N_LAYERS, BI),
        in_specs=in_specs,
        out_specs=pl.BlockSpec((None, 1, 2 * HIDDEN), bmap),
        scratch_shapes=[pltpu.VMEM((BI, S, HIDDEN), jnp.float32)],  # x resident
    )

    pooled = pl.pallas_call(
        bert_fused_kernel,
        out_shape=jax.ShapeDtypeStruct((B, 1, 2 * HIDDEN), jnp.float32),
        grid_spec=grid_spec,
        compiler_params=pltpu.CompilerParams(
            dimension_semantics=("parallel", "arbitrary", "arbitrary"),
            vmem_limit_bytes=48 * 1024 * 1024),
    )(emb, mask_bias,
      params['emb_ln_g'], params['emb_ln_b'],
      params['wqkv'], params['bqkv'], params['wo'], params['bo'],
      params['ln1_g'], params['ln1_b'], params['w1'], params['b1'],
      params['w2'], params['b2'], params['ln2_g'], params['ln2_b'])

    # bert_drop (Dropout 0.3) is identity at inference.
    cat = pooled.reshape(B, 2 * HIDDEN)                      # [B, 2H] = mean||max
    return cat @ params['out_w'] + params['out_b']           # [B, 1]


if __name__ == "__main__":
    key = jax.random.PRNGKey(0)
    kp, ki = jax.random.split(key)
    params = init_params(kp)

    B, S = 2, 8
    ids = jax.random.randint(ki, (B, S), 0, VOCAB, dtype=jnp.int32)
    mask = jnp.array([[1] * S, [1] * (S - 2) + [0] * 2], dtype=jnp.int32)
    token_type_ids = jnp.zeros((B, S), dtype=jnp.int32)

    fwd = jax.jit(bert_base_multi_uncased_forward)
    out = fwd(params, ids, mask, token_type_ids)
    jax.block_until_ready(out)
    assert out.shape == (B, 1)
    print("KERNEL_OK")
</pallas_src>

<mosaic_0001>
module attributes {stable_mosaic.version = 11 : i64} {
  func.func @bert_fused_kernel(%arg0: i32, %arg1: i32, %arg2: i32, %arg3: memref<1x8x32xf32, #tpu.memory_space<vmem>>, %arg4: memref<1x1x8xf32, #tpu.memory_space<vmem>>, %arg5: memref<1x32xf32, #tpu.memory_space<vmem>>, %arg6: memref<1x32xf32, #tpu.memory_space<vmem>>, %arg7: memref<1x32x96xbf16, #tpu.memory_space<vmem>>, %arg8: memref<1x1x96xf32, #tpu.memory_space<vmem>>, %arg9: memref<1x32x32xbf16, #tpu.memory_space<vmem>>, %arg10: memref<1x1x32xf32, #tpu.memory_space<vmem>>, %arg11: memref<1x1x32xf32, #tpu.memory_space<vmem>>, %arg12: memref<1x1x32xf32, #tpu.memory_space<vmem>>, %arg13: memref<1x32x64xbf16, #tpu.memory_space<vmem>>, %arg14: memref<1x1x64xf32, #tpu.memory_space<vmem>>, %arg15: memref<1x64x32xbf16, #tpu.memory_space<vmem>>, %arg16: memref<1x1x32xf32, #tpu.memory_space<vmem>>, %arg17: memref<1x1x32xf32, #tpu.memory_space<vmem>>, %arg18: memref<1x1x32xf32, #tpu.memory_space<vmem>>, %arg19: memref<1x1x64xf32, #tpu.memory_space<vmem>>, %arg20: memref<1x8x32xf32, #tpu.memory_space<vmem>>) attributes {dimension_semantics = [#tpu.dimension_semantics<parallel>, #tpu.dimension_semantics<arbitrary>, #tpu.dimension_semantics<arbitrary>], iteration_bounds = array<i64: 2, 2, 1>, scalar_prefetch = 0 : i64, scratch_operands = 1 : i64, tpu.core_type = #tpu.core_type<tc>, window_params = [{transform_indices = @transform_0, window_bounds = array<i64: 1, 8, 32>}, {transform_indices = @transform_1, window_bounds = array<i64: 1, 1, 8>}, {pipeline_mode = #tpu.pipeline_mode<synchronous>, transform_indices = @transform_2, window_bounds = array<i64: 1, 32>}, {pipeline_mode = #tpu.pipeline_mode<synchronous>, transform_indices = @transform_3, window_bounds = array<i64: 1, 32>}, {transform_indices = @transform_4, window_bounds = array<i64: 1, 32, 96>}, {transform_indices = @transform_5, window_bounds = array<i64: 1, 1, 96>}, {transform_indices = @transform_6, window_bounds = array<i64: 1, 32, 32>}, {transform_indices = @transform_7, window_bounds = array<i64: 1, 1, 32>}, {transform_indices = @transform_8, window_bounds = array<i64: 1, 1, 32>}, {transform_indices = @transform_9, window_bounds = array<i64: 1, 1, 32>}, {transform_indices = @transform_10, window_bounds = array<i64: 1, 32, 64>}, {transform_indices = @transform_11, window_bounds = array<i64: 1, 1, 64>}, {transform_indices = @transform_12, window_bounds = array<i64: 1, 64, 32>}, {transform_indices = @transform_13, window_bounds = array<i64: 1, 1, 32>}, {transform_indices = @transform_14, window_bounds = array<i64: 1, 1, 32>}, {transform_indices = @transform_15, window_bounds = array<i64: 1, 1, 32>}, {transform_indices = @transform_16, window_bounds = array<i64: 1, 1, 64>}]} {
    %c0_i32 = arith.constant 0 : i32
    %0 = arith.cmpi eq, %arg1, %c0_i32 : i32
    %1 = arith.extui %0 : i1 to i32
    %c0_i32_0 = arith.constant 0 : i32
    %2 = arith.cmpi ne, %1, %c0_i32_0 : i32
    scf.if %2 {
      %c0_70 = arith.constant 0 : index
      %c0_71 = arith.constant 0 : index
      %c0_72 = arith.constant 0 : index
      %179 = vector.load %arg3[%c0_70, %c0_71, %c0_72] : memref<1x8x32xf32, #tpu.memory_space<vmem>>, vector<1x8x32xf32>
      %180 = vector.shape_cast %179 : vector<1x8x32xf32> to vector<8x32xf32>
      %c0_73 = arith.constant 0 : index
      %c0_74 = arith.constant 0 : index
      %181 = vector.load %arg5[%c0_73, %c0_74] : memref<1x32xf32, #tpu.memory_space<vmem>>, vector<1x32xf32>
      %c0_75 = arith.constant 0 : index
      %c0_76 = arith.constant 0 : index
      %182 = vector.load %arg6[%c0_75, %c0_76] : memref<1x32xf32, #tpu.memory_space<vmem>>, vector<1x32xf32>
      %cst_77 = arith.constant dense<0.000000e+00> : vector<8xf32>
      %183 = vector.multi_reduction <add>, %180, %cst_77 [1] : vector<8x32xf32> to vector<8xf32>
      %184 = vector.shape_cast %183 : vector<8xf32> to vector<8x1xf32>
      %cst_78 = arith.constant 3.200000e+01 : f32
      %185 = vector.broadcast %cst_78 : f32 to vector<8x1xf32>
      %186 = arith.divf %184, %185 : vector<8x1xf32>
      %187 = vector.broadcast %186 : vector<8x1xf32> to vector<8x32xf32>
      %188 = arith.subf %180, %187 : vector<8x32xf32>
      %189 = arith.mulf %188, %188 : vector<8x32xf32>
      %cst_79 = arith.constant dense<0.000000e+00> : vector<8xf32>
      %190 = vector.multi_reduction <add>, %189, %cst_79 [1] : vector<8x32xf32> to vector<8xf32>
      %191 = vector.shape_cast %190 : vector<8xf32> to vector<8x1xf32>
      %cst_80 = arith.constant 3.200000e+01 : f32
      %192 = vector.broadcast %cst_80 : f32 to vector<8x1xf32>
      %193 = arith.divf %191, %192 : vector<8x1xf32>
      %194 = vector.broadcast %186 : vector<8x1xf32> to vector<8x32xf32>
      %195 = arith.subf %180, %194 : vector<8x32xf32>
      %cst_81 = arith.constant 9.99999996E-13 : f32
      %196 = vector.broadcast %cst_81 : f32 to vector<8x1xf32>
      %197 = arith.addf %193, %196 : vector<8x1xf32>
      %198 = math.rsqrt %197 : vector<8x1xf32>
      %199 = vector.broadcast %198 : vector<8x1xf32> to vector<8x32xf32>
      %200 = arith.mulf %195, %199 : vector<8x32xf32>
      %201 = vector.broadcast %181 : vector<1x32xf32> to vector<8x32xf32>
      %202 = arith.mulf %200, %201 : vector<8x32xf32>
      %203 = vector.broadcast %182 : vector<1x32xf32> to vector<8x32xf32>
      %204 = arith.addf %202, %203 : vector<8x32xf32>
      %205 = arith.index_cast %arg2 : i32 to index
      %c0_82 = arith.constant 0 : index
      %c0_83 = arith.constant 0 : index
      %206 = vector.load %arg20[%205, %c0_82, %c0_83] : memref<1x8x32xf32, #tpu.memory_space<vmem>>, vector<1x8x32xf32>
      %207 = vector.shape_cast %206 : vector<1x8x32xf32> to vector<8x32xf32>
      %208 = vector.shape_cast %204 : vector<8x32xf32> to vector<1x8x32xf32>
      tpu.vector_store %arg20[%205, %c0_82, %c0_83], %208 {strides = array<i32>} : memref<1x8x32xf32, #tpu.memory_space<vmem>>, vector<1x8x32xf32>,
    } else {
    }
    %3 = arith.index_cast %arg2 : i32 to index
    %c0 = arith.constant 0 : index
    %c0_1 = arith.constant 0 : index
    %4 = vector.load %arg20[%3, %c0, %c0_1] : memref<1x8x32xf32, #tpu.memory_space<vmem>>, vector<1x8x32xf32>
    %5 = vector.shape_cast %4 : vector<1x8x32xf32> to vector<8x32xf32>
    %6 = arith.truncf %5 : vector<8x32xf32> to vector<8x32xbf16>
    %c0_2 = arith.constant 0 : index
    %c0_3 = arith.constant 0 : index
    %c0_4 = arith.constant 0 : index
    %7 = vector.load %arg7[%c0_2, %c0_3, %c0_4] : memref<1x32x96xbf16, #tpu.memory_space<vmem>>, vector<1x32x96xbf16>
    %8 = vector.shape_cast %7 : vector<1x32x96xbf16> to vector<32x96xbf16>
    %cst = arith.constant dense<0.000000e+00> : vector<8x96xf32>
    %9 = tpu.matmul %6, %8, %cst {dimension_numbers = #tpu.dot_dimension_numbers<[1], [0], [0], [1], [0, 0, 1, 1], [], []>} : vector<8x32xbf16>, vector<32x96xbf16>, vector<8x96xf32> -> vector<8x96xf32>
    %c0_5 = arith.constant 0 : index
    %c0_6 = arith.constant 0 : index
    %c0_7 = arith.constant 0 : index
    %10 = vector.load %arg8[%c0_5, %c0_6, %c0_7] : memref<1x1x96xf32, #tpu.memory_space<vmem>>, vector<1x1x96xf32>
    %11 = vector.shape_cast %10 : vector<1x1x96xf32> to vector<1x96xf32>
    %12 = vector.broadcast %11 : vector<1x96xf32> to vector<8x96xf32>
    %13 = arith.addf %9, %12 : vector<8x96xf32>
    %14 = vector.extract_strided_slice %13 {offsets = [0, 0], sizes = [8, 32], strides = [1, 1]} : vector<8x96xf32> to vector<8x32xf32>
    %15 = vector.extract_strided_slice %14 {offsets = [0, 0], sizes = [8, 8], strides = [1, 1]} : vector<8x32xf32> to vector<8x8xf32>
    %16 = vector.extract_strided_slice %14 {offsets = [0, 8], sizes = [8, 8], strides = [1, 1]} : vector<8x32xf32> to vector<8x8xf32>
    %17 = vector.extract_strided_slice %14 {offsets = [0, 16], sizes = [8, 8], strides = [1, 1]} : vector<8x32xf32> to vector<8x8xf32>
    %18 = vector.extract_strided_slice %14 {offsets = [0, 24], sizes = [8, 8], strides = [1, 1]} : vector<8x32xf32> to vector<8x8xf32>
    %19 = vector.shape_cast %15 : vector<8x8xf32> to vector<1x8x8xf32>
    %20 = vector.shape_cast %16 : vector<8x8xf32> to vector<1x8x8xf32>
    %21 = vector.shape_cast %17 : vector<8x8xf32> to vector<1x8x8xf32>
    %22 = vector.shape_cast %18 : vector<8x8xf32> to vector<1x8x8xf32>
    %23 = tpu.concatenate %19, %20, %21, %22 in 0 : vector<1x8x8xf32>, vector<1x8x8xf32>, vector<1x8x8xf32>, vector<1x8x8xf32> -> vector<4x8x8xf32>
    %24 = arith.truncf %23 : vector<4x8x8xf32> to vector<4x8x8xbf16>
    %25 = vector.extract_strided_slice %13 {offsets = [0, 32], sizes = [8, 32], strides = [1, 1]} : vector<8x96xf32> to vector<8x32xf32>
    %26 = vector.extract_strided_slice %25 {offsets = [0, 0], sizes = [8, 8], strides = [1, 1]} : vector<8x32xf32> to vector<8x8xf32>
    %27 = vector.extract_strided_slice %25 {offsets = [0, 8], sizes = [8, 8], strides = [1, 1]} : vector<8x32xf32> to vector<8x8xf32>
    %28 = vector.extract_strided_slice %25 {offsets = [0, 16], sizes = [8, 8], strides = [1, 1]} : vector<8x32xf32> to vector<8x8xf32>
    %29 = vector.extract_strided_slice %25 {offsets = [0, 24], sizes = [8, 8], strides = [1, 1]} : vector<8x32xf32> to vector<8x8xf32>
    %30 = vector.shape_cast %26 : vector<8x8xf32> to vector<1x8x8xf32>
    %31 = vector.shape_cast %27 : vector<8x8xf32> to vector<1x8x8xf32>
    %32 = vector.shape_cast %28 : vector<8x8xf32> to vector<1x8x8xf32>
    %33 = vector.shape_cast %29 : vector<8x8xf32> to vector<1x8x8xf32>
    %34 = tpu.concatenate %30, %31, %32, %33 in 0 : vector<1x8x8xf32>, vector<1x8x8xf32>, vector<1x8x8xf32>, vector<1x8x8xf32> -> vector<4x8x8xf32>
    %35 = arith.truncf %34 : vector<4x8x8xf32> to vector<4x8x8xbf16>
    %36 = vector.extract_strided_slice %13 {offsets = [0, 64], sizes = [8, 32], strides = [1, 1]} : vector<8x96xf32> to vector<8x32xf32>
    %37 = vector.extract_strided_slice %36 {offsets = [0, 0], sizes = [8, 8], strides = [1, 1]} : vector<8x32xf32> to vector<8x8xf32>
    %38 = vector.extract_strided_slice %36 {offsets = [0, 8], sizes = [8, 8], strides = [1, 1]} : vector<8x32xf32> to vector<8x8xf32>
    %39 = vector.extract_strided_slice %36 {offsets = [0, 16], sizes = [8, 8], strides = [1, 1]} : vector<8x32xf32> to vector<8x8xf32>
    %40 = vector.extract_strided_slice %36 {offsets = [0, 24], sizes = [8, 8], strides = [1, 1]} : vector<8x32xf32> to vector<8x8xf32>
    %41 = vector.shape_cast %37 : vector<8x8xf32> to vector<1x8x8xf32>
    %42 = vector.shape_cast %38 : vector<8x8xf32> to vector<1x8x8xf32>
    %43 = vector.shape_cast %39 : vector<8x8xf32> to vector<1x8x8xf32>
    %44 = vector.shape_cast %40 : vector<8x8xf32> to vector<1x8x8xf32>
    %45 = tpu.concatenate %41, %42, %43, %44 in 0 : vector<1x8x8xf32>, vector<1x8x8xf32>, vector<1x8x8xf32>, vector<1x8x8xf32> -> vector<4x8x8xf32>
    %46 = arith.truncf %45 : vector<4x8x8xf32> to vector<4x8x8xbf16>
    "tpu.trace_start"() <{level = 10 : i32, message = "hqd,hkd->hqk"}> : () -> ()
    %cst_8 = arith.constant dense<0.000000e+00> : vector<4x8x8xf32>
    %47 = tpu.matmul %24, %35, %cst_8 {dimension_numbers = #tpu.dot_dimension_numbers<[2], [2], [1], [1], [0, 0, 0, 1, 1, 1], [0], [0]>} : vector<4x8x8xbf16>, vector<4x8x8xbf16>, vector<4x8x8xf32> -> vector<4x8x8xf32>
    "tpu.trace_stop"() : () -> ()
    %c0_9 = arith.constant 0 : index
    %c0_10 = arith.constant 0 : index
    %c0_11 = arith.constant 0 : index
    %48 = vector.load %arg4[%c0_9, %c0_10, %c0_11] : memref<1x1x8xf32, #tpu.memory_space<vmem>>, vector<1x1x8xf32>
    %49 = vector.shape_cast %48 : vector<1x1x8xf32> to vector<1x8xf32>
    %50 = vector.shape_cast %49 : vector<1x8xf32> to vector<1x1x8xf32>
    %51 = vector.broadcast %50 : vector<1x1x8xf32> to vector<4x8x8xf32>
    %52 = arith.addf %47, %51 : vector<4x8x8xf32>
    %cst_12 = arith.constant dense<0xFF800000> : vector<4x8xf32>
    %53 = vector.multi_reduction <maximumf>, %52, %cst_12 [2] : vector<4x8x8xf32> to vector<4x8xf32>
    %54 = vector.shape_cast %53 : vector<4x8xf32> to vector<4x8x1xf32>
    %55 = vector.broadcast %54 : vector<4x8x1xf32> to vector<4x8x8xf32>
    %56 = arith.subf %52, %55 : vector<4x8x8xf32>
    %57 = math.exp %56 : vector<4x8x8xf32>
    %cst_13 = arith.constant dense<0.000000e+00> : vector<4x8xf32>
    %58 = vector.multi_reduction <add>, %57, %cst_13 [2] : vector<4x8x8xf32> to vector<4x8xf32>
    %59 = vector.shape_cast %58 : vector<4x8xf32> to vector<4x8x1xf32>
    %60 = tpu.reciprocal %59 {approx = true} : vector<4x8x1xf32> -> vector<4x8x1xf32>
    %61 = vector.broadcast %60 : vector<4x8x1xf32> to vector<4x8x8xf32>
    %62 = arith.mulf %57, %61 : vector<4x8x8xf32>
    %63 = arith.truncf %62 : vector<4x8x8xf32> to vector<4x8x8xbf16>
    "tpu.trace_start"() <{level = 10 : i32, message = "hqk,hkd->hqd"}> : () -> ()
    %cst_14 = arith.constant dense<0.000000e+00> : vector<4x8x8xf32>
    %64 = tpu.matmul %63, %46, %cst_14 {dimension_numbers = #tpu.dot_dimension_numbers<[2], [1], [1], [2], [0, 0, 0, 1, 1, 2], [0], [0]>} : vector<4x8x8xbf16>, vector<4x8x8xbf16>, vector<4x8x8xf32> -> vector<4x8x8xf32>
    "tpu.trace_stop"() : () -> ()
    %65 = vector.extract_strided_slice %64 {offsets = [0, 0, 0], sizes = [1, 8, 8], strides = [1, 1, 1]} : vector<4x8x8xf32> to vector<1x8x8xf32>
    %66 = vector.shape_cast %65 : vector<1x8x8xf32> to vector<8x8xf32>
    %67 = vector.extract_strided_slice %64 {offsets = [1, 0, 0], sizes = [1, 8, 8], strides = [1, 1, 1]} : vector<4x8x8xf32> to vector<1x8x8xf32>
    %68 = vector.shape_cast %67 : vector<1x8x8xf32> to vector<8x8xf32>
    %69 = vector.extract_strided_slice %64 {offsets = [2, 0, 0], sizes = [1, 8, 8], strides = [1, 1, 1]} : vector<4x8x8xf32> to vector<1x8x8xf32>
    %70 = vector.shape_cast %69 : vector<1x8x8xf32> to vector<8x8xf32>
    %71 = vector.extract_strided_slice %64 {offsets = [3, 0, 0], sizes = [1, 8, 8], strides = [1, 1, 1]} : vector<4x8x8xf32> to vector<1x8x8xf32>
    %72 = vector.shape_cast %71 : vector<1x8x8xf32> to vector<8x8xf32>
    %73 = tpu.concatenate %66, %68, %70, %72 in 1 : vector<8x8xf32>, vector<8x8xf32>, vector<8x8xf32>, vector<8x8xf32> -> vector<8x32xf32>
    %74 = arith.truncf %73 : vector<8x32xf32> to vector<8x32xbf16>
    %c0_15 = arith.constant 0 : index
    %c0_16 = arith.constant 0 : index
    %c0_17 = arith.constant 0 : index
    %75 = vector.load %arg9[%c0_15, %c0_16, %c0_17] : memref<1x32x32xbf16, #tpu.memory_space<vmem>>, vector<1x32x32xbf16>
    %76 = vector.shape_cast %75 : vector<1x32x32xbf16> to vector<32x32xbf16>
    %cst_18 = arith.constant dense<0.000000e+00> : vector<8x32xf32>
    %77 = tpu.matmul %74, %76, %cst_18 {dimension_numbers = #tpu.dot_dimension_numbers<[1], [0], [0], [1], [0, 0, 1, 1], [], []>} : vector<8x32xbf16>, vector<32x32xbf16>, vector<8x32xf32> -> vector<8x32xf32>
    %c0_19 = arith.constant 0 : index
    %c0_20 = arith.constant 0 : index
    %c0_21 = arith.constant 0 : index
    %78 = vector.load %arg10[%c0_19, %c0_20, %c0_21] : memref<1x1x32xf32, #tpu.memory_space<vmem>>, vector<1x1x32xf32>
    %79 = vector.shape_cast %78 : vector<1x1x32xf32> to vector<1x32xf32>
    %80 = vector.broadcast %79 : vector<1x32xf32> to vector<8x32xf32>
    %81 = arith.addf %77, %80 : vector<8x32xf32>
    %82 = arith.addf %5, %81 : vector<8x32xf32>
    %c0_22 = arith.constant 0 : index
    %c0_23 = arith.constant 0 : index
    %c0_24 = arith.constant 0 : index
    %83 = vector.load %arg11[%c0_22, %c0_23, %c0_24] : memref<1x1x32xf32, #tpu.memory_space<vmem>>, vector<1x1x32xf32>
    %84 = vector.shape_cast %83 : vector<1x1x32xf32> to vector<1x32xf32>
    %c0_25 = arith.constant 0 : index
    %c0_26 = arith.constant 0 : index
    %c0_27 = arith.constant 0 : index
    %85 = vector.load %arg12[%c0_25, %c0_26, %c0_27] : memref<1x1x32xf32, #tpu.memory_space<vmem>>, vector<1x1x32xf32>
    %86 = vector.shape_cast %85 : vector<1x1x32xf32> to vector<1x32xf32>
    %cst_28 = arith.constant dense<0.000000e+00> : vector<8xf32>
    %87 = vector.multi_reduction <add>, %82, %cst_28 [1] : vector<8x32xf32> to vector<8xf32>
    %88 = vector.shape_cast %87 : vector<8xf32> to vector<8x1xf32>
    %cst_29 = arith.constant 3.200000e+01 : f32
    %89 = vector.broadcast %cst_29 : f32 to vector<8x1xf32>
    %90 = arith.divf %88, %89 : vector<8x1xf32>
    %91 = vector.broadcast %90 : vector<8x1xf32> to vector<8x32xf32>
    %92 = arith.subf %82, %91 : vector<8x32xf32>
    %93 = arith.mulf %92, %92 : vector<8x32xf32>
    %cst_30 = arith.constant dense<0.000000e+00> : vector<8xf32>
    %94 = vector.multi_reduction <add>, %93, %cst_30 [1] : vector<8x32xf32> to vector<8xf32>
    %95 = vector.shape_cast %94 : vector<8xf32> to vector<8x1xf32>
    %cst_31 = arith.constant 3.200000e+01 : f32
    %96 = vector.broadcast %cst_31 : f32 to vector<8x1xf32>
    %97 = arith.divf %95, %96 : vector<8x1xf32>
    %98 = vector.broadcast %90 : vector<8x1xf32> to vector<8x32xf32>
    %99 = arith.subf %82, %98 : vector<8x32xf32>
    %cst_32 = arith.constant 9.99999996E-13 : f32
    %100 = vector.broadcast %cst_32 : f32 to vector<8x1xf32>
    %101 = arith.addf %97, %100 : vector<8x1xf32>
    %102 = math.rsqrt %101 : vector<8x1xf32>
    %103 = vector.broadcast %102 : vector<8x1xf32> to vector<8x32xf32>
    %104 = arith.mulf %99, %103 : vector<8x32xf32>
    %105 = vector.broadcast %84 : vector<1x32xf32> to vector<8x32xf32>
    %106 = arith.mulf %104, %105 : vector<8x32xf32>
    %107 = vector.broadcast %86 : vector<1x32xf32> to vector<8x32xf32>
    %108 = arith.addf %106, %107 : vector<8x32xf32>
    %109 = arith.truncf %108 : vector<8x32xf32> to vector<8x32xbf16>
    %c0_33 = arith.constant 0 : index
    %c0_34 = arith.constant 0 : index
    %c0_35 = arith.constant 0 : index
    %110 = vector.load %arg13[%c0_33, %c0_34, %c0_35] : memref<1x32x64xbf16, #tpu.memory_space<vmem>>, vector<1x32x64xbf16>
    %111 = vector.shape_cast %110 : vector<1x32x64xbf16> to vector<32x64xbf16>
    %cst_36 = arith.constant dense<0.000000e+00> : vector<8x64xf32>
    %112 = tpu.matmul %109, %111, %cst_36 {dimension_numbers = #tpu.dot_dimension_numbers<[1], [0], [0], [1], [0, 0, 1, 1], [], []>} : vector<8x32xbf16>, vector<32x64xbf16>, vector<8x64xf32> -> vector<8x64xf32>
    %c0_37 = arith.constant 0 : index
    %c0_38 = arith.constant 0 : index
    %c0_39 = arith.constant 0 : index
    %113 = vector.load %arg14[%c0_37, %c0_38, %c0_39] : memref<1x1x64xf32, #tpu.memory_space<vmem>>, vector<1x1x64xf32>
    %114 = vector.shape_cast %113 : vector<1x1x64xf32> to vector<1x64xf32>
    %115 = vector.broadcast %114 : vector<1x64xf32> to vector<8x64xf32>
    %116 = arith.addf %112, %115 : vector<8x64xf32>
    %117 = arith.mulf %116, %116 : vector<8x64xf32>
    %118 = arith.mulf %116, %117 : vector<8x64xf32>
    %cst_40 = arith.constant 4.471500e-02 : f32
    %119 = vector.broadcast %cst_40 : f32 to vector<8x64xf32>
    %120 = arith.mulf %119, %118 : vector<8x64xf32>
    %121 = arith.addf %116, %120 : vector<8x64xf32>
    %cst_41 = arith.constant 0.797884583 : f32
    %122 = vector.broadcast %cst_41 : f32 to vector<8x64xf32>
    %123 = arith.mulf %122, %121 : vector<8x64xf32>
    %124 = math.tanh %123 : vector<8x64xf32>
    %cst_42 = arith.constant 1.000000e+00 : f32
    %125 = vector.broadcast %cst_42 : f32 to vector<8x64xf32>
    %126 = arith.addf %125, %124 : vector<8x64xf32>
    %cst_43 = arith.constant 5.000000e-01 : f32
    %127 = vector.broadcast %cst_43 : f32 to vector<8x64xf32>
    %128 = arith.mulf %127, %126 : vector<8x64xf32>
    %129 = arith.mulf %116, %128 : vector<8x64xf32>
    %130 = arith.truncf %129 : vector<8x64xf32> to vector<8x64xbf16>
    %c0_44 = arith.constant 0 : index
    %c0_45 = arith.constant 0 : index
    %c0_46 = arith.constant 0 : index
    %131 = vector.load %arg15[%c0_44, %c0_45, %c0_46] : memref<1x64x32xbf16, #tpu.memory_space<vmem>>, vector<1x64x32xbf16>
    %132 = vector.shape_cast %131 : vector<1x64x32xbf16> to vector<64x32xbf16>
    %cst_47 = arith.constant dense<0.000000e+00> : vector<8x32xf32>
    %133 = tpu.matmul %130, %132, %cst_47 {dimension_numbers = #tpu.dot_dimension_numbers<[1], [0], [0], [1], [0, 0, 1, 1], [], []>} : vector<8x64xbf16>, vector<64x32xbf16>, vector<8x32xf32> -> vector<8x32xf32>
    %c0_48 = arith.constant 0 : index
    %c0_49 = arith.constant 0 : index
    %c0_50 = arith.constant 0 : index
    %134 = vector.load %arg16[%c0_48, %c0_49, %c0_50] : memref<1x1x32xf32, #tpu.memory_space<vmem>>, vector<1x1x32xf32>
    %135 = vector.shape_cast %134 : vector<1x1x32xf32> to vector<1x32xf32>
    %136 = vector.broadcast %135 : vector<1x32xf32> to vector<8x32xf32>
    %137 = arith.addf %133, %136 : vector<8x32xf32>
    %138 = arith.addf %108, %137 : vector<8x32xf32>
    %c0_51 = arith.constant 0 : index
    %c0_52 = arith.constant 0 : index
    %c0_53 = arith.constant 0 : index
    %139 = vector.load %arg17[%c0_51, %c0_52, %c0_53] : memref<1x1x32xf32, #tpu.memory_space<vmem>>, vector<1x1x32xf32>
    %140 = vector.shape_cast %139 : vector<1x1x32xf32> to vector<1x32xf32>
    %c0_54 = arith.constant 0 : index
    %c0_55 = arith.constant 0 : index
    %c0_56 = arith.constant 0 : index
    %141 = vector.load %arg18[%c0_54, %c0_55, %c0_56] : memref<1x1x32xf32, #tpu.memory_space<vmem>>, vector<1x1x32xf32>
    %142 = vector.shape_cast %141 : vector<1x1x32xf32> to vector<1x32xf32>
    %cst_57 = arith.constant dense<0.000000e+00> : vector<8xf32>
    %143 = vector.multi_reduction <add>, %138, %cst_57 [1] : vector<8x32xf32> to vector<8xf32>
    %144 = vector.shape_cast %143 : vector<8xf32> to vector<8x1xf32>
    %cst_58 = arith.constant 3.200000e+01 : f32
    %145 = vector.broadcast %cst_58 : f32 to vector<8x1xf32>
    %146 = arith.divf %144, %145 : vector<8x1xf32>
    %147 = vector.broadcast %146 : vector<8x1xf32> to vector<8x32xf32>
    %148 = arith.subf %138, %147 : vector<8x32xf32>
    %149 = arith.mulf %148, %148 : vector<8x32xf32>
    %cst_59 = arith.constant dense<0.000000e+00> : vector<8xf32>
    %150 = vector.multi_reduction <add>, %149, %cst_59 [1] : vector<8x32xf32> to vector<8xf32>
    %151 = vector.shape_cast %150 : vector<8xf32> to vector<8x1xf32>
    %cst_60 = arith.constant 3.200000e+01 : f32
    %152 = vector.broadcast %cst_60 : f32 to vector<8x1xf32>
    %153 = arith.divf %151, %152 : vector<8x1xf32>
    %154 = vector.broadcast %146 : vector<8x1xf32> to vector<8x32xf32>
    %155 = arith.subf %138, %154 : vector<8x32xf32>
    %cst_61 = arith.constant 9.99999996E-13 : f32
    %156 = vector.broadcast %cst_61 : f32 to vector<8x1xf32>
    %157 = arith.addf %153, %156 : vector<8x1xf32>
    %158 = math.rsqrt %157 : vector<8x1xf32>
    %159 = vector.broadcast %158 : vector<8x1xf32> to vector<8x32xf32>
    %160 = arith.mulf %155, %159 : vector<8x32xf32>
    %161 = vector.broadcast %140 : vector<1x32xf32> to vector<8x32xf32>
    %162 = arith.mulf %160, %161 : vector<8x32xf32>
    %163 = vector.broadcast %142 : vector<1x32xf32> to vector<8x32xf32>
    %164 = arith.addf %162, %163 : vector<8x32xf32>
    %165 = arith.index_cast %arg2 : i32 to index
    %c0_62 = arith.constant 0 : index
    %c0_63 = arith.constant 0 : index
    %166 = vector.load %arg20[%165, %c0_62, %c0_63] : memref<1x8x32xf32, #tpu.memory_space<vmem>>, vector<1x8x32xf32>
    %167 = vector.shape_cast %166 : vector<1x8x32xf32> to vector<8x32xf32>
    %168 = vector.shape_cast %164 : vector<8x32xf32> to vector<1x8x32xf32>
    tpu.vector_store %arg20[%165, %c0_62, %c0_63], %168 {strides = array<i32>} : memref<1x8x32xf32, #tpu.memory_space<vmem>>, vector<1x8x32xf32>,
    %cst_64 = arith.constant dense<0.000000e+00> : vector<32xf32>
    %169 = vector.multi_reduction <add>, %164, %cst_64 [0] : vector<8x32xf32> to vector<32xf32>
    %170 = vector.shape_cast %169 : vector<32xf32> to vector<1x32xf32>
    %cst_65 = arith.constant 8.000000e+00 : f32
    %171 = vector.broadcast %cst_65 : f32 to vector<1x32xf32>
    %172 = arith.divf %170, %171 : vector<1x32xf32>
    %cst_66 = arith.constant dense<0xFF800000> : vector<32xf32>
    %173 = vector.multi_reduction <maximumf>, %164, %cst_66 [0] : vector<8x32xf32> to vector<32xf32>
    %174 = vector.shape_cast %173 : vector<32xf32> to vector<1x32xf32>
    %175 = tpu.concatenate %172, %174 in 1 : vector<1x32xf32>, vector<1x32xf32> -> vector<1x64xf32>
    %c0_67 = arith.constant 0 : index
    %c0_68 = arith.constant 0 : index
    %c0_69 = arith.constant 0 : index
    %176 = vector.load %arg19[%c0_67, %c0_68, %c0_69] : memref<1x1x64xf32, #tpu.memory_space<vmem>>, vector<1x1x64xf32>
    %177 = vector.shape_cast %176 : vector<1x1x64xf32> to vector<1x64xf32>
    %178 = vector.shape_cast %175 : vector<1x64xf32> to vector<1x1x64xf32>
    tpu.vector_store %arg19[%c0_67, %c0_68, %c0_69], %178 {strides = array<i32>} : memref<1x1x64xf32, #tpu.memory_space<vmem>>, vector<1x1x64xf32>,
    return
  }
  func.func @transform_0(%arg0: i32, %arg1: i32, %arg2: i32) -> (i32, i32, i32) {
    %c1_i32 = arith.constant 1 : i32
    %0 = arith.muli %arg0, %c1_i32 : i32
    %1 = arith.addi %0, %arg2 : i32
    %c0_i32 = arith.constant 0 : i32
    %c0_i32_0 = arith.constant 0 : i32
    %c0_i32_1 = arith.constant 0 : i32
    return %1, %c0_i32, %c0_i32_0 : i32, i32, i32
  }
  func.func @transform_1(%arg0: i32, %arg1: i32, %arg2: i32) -> (i32, i32, i32) {
    %c1_i32 = arith.constant 1 : i32
    %0 = arith.muli %arg0, %c1_i32 : i32
    %1 = arith.addi %0, %arg2 : i32
    %c0_i32 = arith.constant 0 : i32
    %c0_i32_0 = arith.constant 0 : i32
    %c0_i32_1 = arith.constant 0 : i32
    return %1, %c0_i32, %c0_i32_0 : i32, i32, i32
  }
  func.func @transform_2(%arg0: i32, %arg1: i32, %arg2: i32) -> (i32, i32) {
    %c0_i32 = arith.constant 0 : i32
    %c0_i32_0 = arith.constant 0 : i32
    %c0_i32_1 = arith.constant 0 : i32
    return %c0_i32, %c0_i32_0 : i32, i32
  }
  func.func @transform_3(%arg0: i32, %arg1: i32, %arg2: i32) -> (i32, i32) {
    %c0_i32 = arith.constant 0 : i32
    %c0_i32_0 = arith.constant 0 : i32
    %c0_i32_1 = arith.constant 0 : i32
    return %c0_i32, %c0_i32_0 : i32, i32
  }
  func.func @transform_4(%arg0: i32, %arg1: i32, %arg2: i32) -> (i32, i32, i32) {
    %c0_i32 = arith.constant 0 : i32
    %c0_i32_0 = arith.constant 0 : i32
    %c0_i32_1 = arith.constant 0 : i32
    return %arg1, %c0_i32, %c0_i32_0 : i32, i32, i32
  }
  func.func @transform_5(%arg0: i32, %arg1: i32, %arg2: i32) -> (i32, i32, i32) {
    %c0_i32 = arith.constant 0 : i32
    %c0_i32_0 = arith.constant 0 : i32
    %c0_i32_1 = arith.constant 0 : i32
    return %arg1, %c0_i32, %c0_i32_0 : i32, i32, i32
  }
  func.func @transform_6(%arg0: i32, %arg1: i32, %arg2: i32) -> (i32, i32, i32) {
    %c0_i32 = arith.constant 0 : i32
    %c0_i32_0 = arith.constant 0 : i32
    %c0_i32_1 = arith.constant 0 : i32
    return %arg1, %c0_i32, %c0_i32_0 : i32, i32, i32
  }
  func.func @transform_7(%arg0: i32, %arg1: i32, %arg2: i32) -> (i32, i32, i32) {
    %c0_i32 = arith.constant 0 : i32
    %c0_i32_0 = arith.constant 0 : i32
    %c0_i32_1 = arith.constant 0 : i32
    return %arg1, %c0_i32, %c0_i32_0 : i32, i32, i32
  }
  func.func @transform_8(%arg0: i32, %arg1: i32, %arg2: i32) -> (i32, i32, i32) {
    %c0_i32 = arith.constant 0 : i32
    %c0_i32_0 = arith.constant 0 : i32
    %c0_i32_1 = arith.constant 0 : i32
    return %arg1, %c0_i32, %c0_i32_0 : i32, i32, i32
  }
  func.func @transform_9(%arg0: i32, %arg1: i32, %arg2: i32) -> (i32, i32, i32) {
    %c0_i32 = arith.constant 0 : i32
    %c0_i32_0 = arith.constant 0 : i32
    %c0_i32_1 = arith.constant 0 : i32
    return %arg1, %c0_i32, %c0_i32_0 : i32, i32, i32
  }
  func.func @transform_10(%arg0: i32, %arg1: i32, %arg2: i32) -> (i32, i32, i32) {
    %c0_i32 = arith.constant 0 : i32
    %c0_i32_0 = arith.constant 0 : i32
    %c0_i32_1 = arith.constant 0 : i32
    return %arg1, %c0_i32, %c0_i32_0 : i32, i32, i32
  }
  func.func @transform_11(%arg0: i32, %arg1: i32, %arg2: i32) -> (i32, i32, i32) {
    %c0_i32 = arith.constant 0 : i32
    %c0_i32_0 = arith.constant 0 : i32
    %c0_i32_1 = arith.constant 0 : i32
    return %arg1, %c0_i32, %c0_i32_0 : i32, i32, i32
  }
  func.func @transform_12(%arg0: i32, %arg1: i32, %arg2: i32) -> (i32, i32, i32) {
    %c0_i32 = arith.constant 0 : i32
    %c0_i32_0 = arith.constant 0 : i32
    %c0_i32_1 = arith.constant 0 : i32
    return %arg1, %c0_i32, %c0_i32_0 : i32, i32, i32
  }
  func.func @transform_13(%arg0: i32, %arg1: i32, %arg2: i32) -> (i32, i32, i32) {
    %c0_i32 = arith.constant 0 : i32
    %c0_i32_0 = arith.constant 0 : i32
    %c0_i32_1 = arith.constant 0 : i32
    return %arg1, %c0_i32, %c0_i32_0 : i32, i32, i32
  }
  func.func @transform_14(%arg0: i32, %arg1: i32, %arg2: i32) -> (i32, i32, i32) {
    %c0_i32 = arith.constant 0 : i32
    %c0_i32_0 = arith.constant 0 : i32
    %c0_i32_1 = arith.constant 0 : i32
    return %arg1, %c0_i32, %c0_i32_0 : i32, i32, i32
  }
  func.func @transform_15(%arg0: i32, %arg1: i32, %arg2: i32) -> (i32, i32, i32) {
    %c0_i32 = arith.constant 0 : i32
    %c0_i32_0 = arith.constant 0 : i32
    %c0_i32_1 = arith.constant 0 : i32
    return %arg1, %c0_i32, %c0_i32_0 : i32, i32, i32
  }
  func.func @transform_16(%arg0: i32, %arg1: i32, %arg2: i32) -> (i32, i32, i32) {
    %c1_i32 = arith.constant 1 : i32
    %0 = arith.muli %arg0, %c1_i32 : i32
    %1 = arith.addi %0, %arg2 : i32
    %c0_i32 = arith.constant 0 : i32
    %c0_i32_0 = arith.constant 0 : i32
    %c0_i32_1 = arith.constant 0 : i32
    return %1, %c0_i32, %c0_i32_0 : i32, i32, i32
  }
}

</mosaic_0001>

<bundles_post_ra>
// kernel: bert_base_multi_uncased_forward.1
= control target key start
LH: loop header
LB: loop body
LE: loop exit
PB: predicated region body
PF: predicated region fallthrough
CT: control target
= control target key end

     0   :  { %s2245_s21 = smov 0   ;;  %s2247_s22 = smov 0   ;;  %s2536_s0 = inlined_call_operand.vmem [shape: f32[2,8,32], index: 0, kind: input, shape index: {}]   ;;  %s2537_s1 = inlined_call_operand.vmem [shape: f32[2,1,8], index: 1, kind: input, shape index: {}]   ;;  %s2538_s2 = inlined_call_operand.vmem [shape: f32[1,32], index: 2, kind: input, shape index: {}]   ;;  %s2539_s3 = inlined_call_operand.vmem [shape: f32[1,32], index: 3, kind: input, shape index: {}]   ;;  %s2540_s4 = inlined_call_operand.vmem [shape: bf16[2,32,96], index: 4, kind: input, shape index: {}]   ;;  %s2541_s5 = inlined_call_operand.vmem [shape: f32[2,1,96], index: 5, kind: input, shape index: {}]   ;;  %s2542_s6 = inlined_call_operand.vmem [shape: bf16[2,32,32], index: 6, kind: input, shape index: {}]   ;;  %s2543_s7 = inlined_call_operand.vmem [shape: f32[2,1,32], index: 7, kind: input, shape index: {}]   ;;  %s2544_s8 = inlined_call_operand.vmem [shape: f32[2,1,32], index: 8, kind: input, shape index: {}]   ;;  %s2545_s9 = inlined_call_operand.vmem [shape: f32[2,1,32], index: 9, kind: input, shape index: {}]   ;;  %s2546_s10 = inlined_call_operand.vmem [shape: bf16[2,32,64], index: 10, kind: input, shape index: {}]   ;;  %s2547_s11 = inlined_call_operand.vmem [shape: f32[2,1,64], index: 11, kind: input, shape index: {}]   ;;  %s2548_s12 = inlined_call_operand.vmem [shape: bf16[2,64,32], index: 12, kind: input, shape index: {}]   ;;  %s2549_s13 = inlined_call_operand.vmem [shape: f32[2,1,32], index: 13, kind: input, shape index: {}]   ;;  %s2550_s14 = inlined_call_operand.vmem [shape: f32[2,1,32], index: 14, kind: input, shape index: {}]   ;;  %s2551_s15 = inlined_call_operand.vmem [shape: f32[2,1,32], index: 15, kind: input, shape index: {}]   ;;  %s2552_s16 = inlined_call_operand.vmem [shape: f32[2,1,64], index: 16, kind: output, shape index: {}]  }
   0x1   :  { %2557 = sst [smem:[#allocation9_spill]] %s2536_s0  ;;  %s2249_s23 = smov 0  }
   0x2   :  { %2558 = sst [smem:[#allocation10_spill]] %s2537_s1  ;;  %s2251_s24 = smov 0  }
   0x3   :  { %2559 = sst [smem:[#allocation11_spill]] %s2538_s2  ;;  %s2253_s25 = smov 0  }
   0x4   :  { %2560 = sst [smem:[#allocation12_spill]] %s2539_s3 }
   0x5   :  { %2561 = sst [smem:[#allocation13_spill]] %s2540_s4 }
   0x6   :  { %2562 = sst [smem:[#allocation14_spill]] %s2542_s6 }
   0x7   :  { %2563 = sst [smem:[#allocation15_spill]] %s2545_s9 }
   0x8   :  { %2564 = sst [smem:[#allocation16_spill]] %s2546_s10 }
   0x9   :  { %2565 = sst [smem:[#allocation17_spill]] %s2547_s11 }
   0xa   :  { %2566 = sst [smem:[#allocation18_spill]] %s2551_s15 }
   0xb   :  { %2567 = sst [smem:[#allocation19_spill]] %s2552_s16 }
   0xc LB: > { %2568 = sst [smem:[#allocation3_spill]] %s2131_s21  ;;  %s41_s26 = sadd.s32 1, %s2139_s23  ;;  %s2147_s25 = sphi %s2253_s25, %s26_s25   ;;  %s2143_s24 = sphi %s2251_s24, %s2601_s24   ;;  %s2139_s23 = sphi %s2249_s23, %s2600_s23   ;;  %s2135_s22 = sphi %s2247_s22, %s2599_s22   ;;  %s2131_s21 = sphi %s2245_s21, %s2598_s21  }
   0xd   : > { %2569 = sst [smem:[#allocation4_spill]] %s2139_s23  ;;  %s45_s27 = sadd.s32 1, %s2143_s24 }
   0xe   : > { %2570 = sst [smem:[#allocation5_spill]] %s2143_s24  ;;  %p43_p0 = scmp.ge.s32.totalorder %s41_s26, 2 }
   0xf   : > { %2571 = sst [smem:[#allocation6_spill]] %s2147_s25  ;;  %p1860_p1 = scmp.ge.s32.totalorder %s2147_s25, 1 }
  0x10   : > { %p602_p2 = scmp.lt.s32.totalorder %s2147_s25, 5  ;;  %s2603_s26 = smov (%p43_p0, %s41_s26), 0 }
  0x11   : > { %2572 = sst [smem:[#allocation7_spill]] %s2603_s26  ;;  %s2605_s27 = smov (!%p43_p0, %s45_s27), %s2143_s24 }
  0x12   : > { %p603_p3 = pnand %p1860_p1, %p602_p2  ;;  %p47_p4 = scmp.ge.s32.totalorder %s2605_s27, 2 }
  0x13   : > { %p700_p5 = scmp.lt.s32.totalorder (!%p603_p3), %s2135_s22, 1  ;;  %p710_p6 = scmp.lt.s32.totalorder (!%p603_p3), %s2131_s21, 1 }
  0x14   : > { %s2607_s27 = smov (%p47_p4, %s2605_s27), 0  ;;  %606 = sbr.rel (%p603_p3) target bundleno = 3115 (0xc2b), region = 84 }
  0x15   : > { %2573 = sst [smem:[#allocation8_spill]] %s2607_s27  ;;  %s2575_s20 = sld [smem:[#allocation9_spill]] (!%p603_p3) }
  0x16   : > { %s2576_s4 = sld [smem:[#allocation13_spill]] (!%p603_p3)  ;;  %s2577_s6 = sld [smem:[#allocation14_spill]] (!%p603_p3) }
  0x17   : > { %s2579_s10 = sld [smem:[#allocation16_spill]] (!%p603_p3)  ;;  %s2583_s9 = sld [smem:[#allocation3_spill]] (!%p603_p3) }
  0x1b   : > { %s2609_s22 = smov (!%p700_p5, %s2135_s22), 1 }
  0x1c   : > { %s2281_s28 = scalar_select %p710_p6, %s2131_s21, 1 }
  0x1d   : > { %s1861_s29 = sshll.u32 %s2609_s22, 3  ;;  %s2582_s21 = sld [smem:[#allocation19_spill]] }
  0x1e   : > { %s703_s27 = scalar_lea.vmem %s2575_s20, %s1861_s29  ;;  %s1906_s26 = sshll.u32 %s2281_s28, 4 }
  0x1f   : > { %s2295_s25 = scalar_lea.vmem %s2576_s4, %s1906_s26  ;;  %s2304_s30 = scalar_lea.vmem %s2577_s6, %s1906_s26 }
  0x20   : > { %s2321_s3 = scalar_lea.vmem %s2579_s10, %s1906_s26  ;;  %s1909_s6 = sshll.u32 %s2281_s28, 5 }
  0x21   : > { %s747_s18 = scalar_lea.vmem %s2549_s13, %s2281_s28  ;;  %s2335_s20 = scalar_lea.vmem %s2548_s12, %s1909_s6 }
  0x22   : > { %s750_s1 = scalar_lea.vmem %s2550_s14, %s2281_s28  ;;  %s2581_s4 = sld [smem:[#allocation18_spill]] }
  0x23   : > { %s757_s11 = scalar_lea.vmem %s2582_s21, %s2609_s22  ;;  %p1870_p7 = scmp.ne.s32.totalorder %s2583_s9, 0 }
  0x24   : > { %v764_v0 = vld [vmem:[%s703_s27] sm:$0xff] (!%p1870_p7)  ;;  %vm767_vm0 = vcmask (!%p1870_p7), 261120   ;;  %s2584_s9 = sld [smem:[#allocation11_spill]] (!%p1870_p7)  ;;  %s2585_s17 = sld [smem:[#allocation12_spill]] (!%p1870_p7) }
  0x25   : > { %763 = sbr.rel (%p1870_p7) target bundleno = 351 (0x15f), region = 88  ;;  %v768_v1 = vsel (!%p1870_p7), %vm767_vm0, %v764_v0, 0.0 }
  0x26   : > { %769 = vadd.xlane.f32.xlu0 (!%p1870_p7), %v768_v1 }
  0x28   : > { %s753_s10 = scalar_lea.vmem %s2581_s4, %s2281_s28 }
  0x2a   : > { %v1871_v11 = vld [vmem:[%s2584_s9] ss:$0 sm:$0xff] (!%p1870_p7) }
  0x2b   : > { %v1872_v13 = vld [vmem:[%s2585_s17] ss:$0 sm:$0xff] (!%p1870_p7) }
  0xb3   : > { %v770_v2 = vpop.xlane.xlu0 %769 }
  0xb4   : > { %v772_v3 = vmul.f32 0.03125, %v770_v2 }
  0xb6   : > { %v773_v4 = vsub.f32 %v764_v0, %v772_v3 }
  0xb8   : > { %v774_v5 = vmul.f32 %v773_v4, %v773_v4 }
  0xba   : > { %v775_v6 = vsel %vm767_vm0, %v774_v5, 0.0 }
  0xbb   : > { %776 = vadd.xlane.f32.xlu0 %v775_v6 }
 0x148   : > { %v777_v7 = vpop.xlane.xlu0 %776 }
 0x149   : > { %v778_v8 = vmul.f32 0.03125, %v777_v7 }
 0x14b   : > { %v779_v9 = vadd.f32 1e-12, %v778_v8 }
 0x14d   : > { %2075 = vrsqrt.f32 %v779_v9 }
 0x157   : > { %v2076_v10 = vpop.eup %2075 }
 0x158   : > { %v781_v12 = vmul.f32 %v2076_v10, %v773_v4 }
 0x15a   : > { %v788_v14 = vmul.f32 %v1871_v11, %v781_v12 }
 0x15c   : > { %v795_v15 = vadd.f32 %v1872_v13, %v788_v14 }
 0x15e   : > { %798 = vst.msk [vmem:[#allocation2] sm:$0xff] %vm767_vm0, %v795_v15 }
 0x15f PF: > { %v2077_v16 = vld [vmem:[%s2295_s25] sm:$0xff]   ;;  %v2149_v17 = vmov 0.0   ;;  %v2078_v18 = vld [vmem:[%s2295_s25 + $0x8] sm:$0xff]   ;;  %vm2150_vm1 = vmmov 0   ;;  %vm826_vm2 = vcmask 261120   ;;  %s2586_s29 = scalar_lea.vmem %s2541_s5, %s2281_s28  ;;  %s2151_s19 = smov 104  }
 0x160   : > { %1940 = vmatprep.subr.bf16.mxu0 %v2149_v17  ;;  %1948 = vmatprep.subr.bf16.mxu1 %v2149_v17  ;;  %v1873_v21 = vld [vmem:[%s2586_s29] ss:$0 sm:$0xff]  ;;  %s2152_s23 = smov 120   ;;  %s2153_s24 = smov 112   ;;  %vm894_vm3 = vcmask 64512   ;;  %vm1141_vm4 = vcmask 1043456  }
 0x161   : > { %1941 = vmatpush3.bf16.msra.mxu0 %v2077_v16  ;;  %1944 = vmatprep.mubr.msk.bf16.mxu0 %vm2150_vm1, %v2149_v17  ;;  %s2154_s26 = smov 96   ;;  %s2587_s16 = sld [smem:[#allocation10_spill]]  ;;  %vm1342_vm5 = vcmask 130048   ;;  %vm1344_vm6 = vcmask 195584   ;;  %vm1560_vm7 = vcmask 523264   ;;  %vm1656_vm8 = vcmask 516096  }
 0x162   : > { %1942 = vmatprep.subr.bf16.mxu0 %v2149_v17  ;;  %1950 = vmatprep.mubr.msk.bf16.mxu1 %vm2150_vm1, %v2149_v17  ;;  %s2155_s6 = smov 64   ;;  %s2156_s9 = smov 8  }
 0x163   : > { %s2157_s21 = smov 16   ;;  %s2158_s27 = smov 24  }
 0x164   : > { %s2589_s25 = scalar_lea.vmem %s2543_s7, %s2281_s28 }
 0x165   : > { %v2365_v19 = vld [vmem:[#allocation2] sm:$0xff]  ;;  %1943 = vmatpush3.bf16.msra.mxu0 %v2078_v18 }
 0x166   : > { %v802_v20 = vpack.c.bf16 %v2365_v19, %v2365_v19  ;;  %1954 = vmatprep.subr.bf16.mxu0 %v2149_v17 }
 0x167   : > { %s2588_s4 = scalar_lea.vmem %s2587_s16, %s2609_s22  ;;  %s2593_s16 = sld [smem:[#allocation17_spill]] }
 0x168   : > { %1945 = vmatmul.mubr.msk.bf16.vlgmr.msra.gmra.mrb[0].mxu0 %vm826_vm2, %v802_v20  ;;  %v1877_v42 = vld [vmem:[%s2588_s4] ss:$0 sm:$0xff] }
 0x169   : > { %1956 = vmatprep.mubr.msk.bf16.mxu0 %vm2150_vm1, %v2149_v17 }
 0x16d   : > { %s2594_s4 = scalar_lea.vmem %s2593_s16, %s2281_s28 }
 0x23b   : > { %v864_v22 = vpop.f32.mrb[0].mxu0 }
 0x23c   : > { %v865_v23 = vadd.f32 %v1873_v21, %v864_v22  ;;  %v1946_v24 = vpop.f32.mrb[1].mxu0 }
 0x23d   : > { %v867_v25 = vpop.f32.mrb[2].mxu0 }
 0x23e   : > { %877 = vrot.lane.b32.xlu1 %v865_v23, %s2151_s19  ;;  %871 = vrot.lane.b32.xlu0 %v865_v23, %s2152_s23  ;;  %v1947_v26 = vpop.f32.mrb[3].mxu0  ;;  %v2381_v27 = vpack.c.bf16 %v865_v23, %v865_v23  ;;  %s2590_s19 = scalar_lea.vmem %s2544_s8, %s2281_s28 }
 0x242   : > { %874 = vrot.lane.b32.xlu0 %v865_v23, %s2153_s24  ;;  %892 = vrot.lane.b32.xlu1 %v2381_v27, %s2154_s26 }
 0x2b0   : > { %v878_v28 = vpop.permute.xlu1 %877  ;;  %v872_v29 = vpop.permute.xlu0 %871 }
 0x2b1   : > { %v881_v30 = vpack.c.bf16 %v872_v29, %v872_v29  ;;  %v2384_v33 = vpack.c.bf16 %v878_v28, %v878_v28 }
 0x2b3   : > { %942 = vrot.lane.b32.xlu0 %v881_v30, %s2154_s26 }
 0x2b4   : > { %v875_v31 = vpop.permute.xlu0 %874  ;;  %v893_v32 = vpop.permute.xlu1 %892 }
 0x2b5   : > { %v2386_v34 = vpack.c.bf16 %v875_v31, %v875_v31  ;;  %v899_v35 = vsel %vm894_vm3, %v893_v32, 0 }
 0x2b6   : > { %1949 = vmatpush3.bf16.xpose.msra.mxu1 %v899_v35 }
 0x2b7   : > { %1040 = vrot.lane.b32.xlu0 %v2384_v33, %s2154_s26  ;;  %991 = vrot.lane.b32.xlu1 %v2386_v34, %s2154_s26 }
 0x2b8   : > { %1960 = vmatprep.subr.bf16.mxu1 %v2149_v17 }
 0x2bd   : > { %1951 = vmatmul.mubr.msk.bf16.vlgmr.msra.gmra.mrb[0].mxu1 %vm894_vm3, %v2381_v27 }
 0x2be   : > { %1962 = vmatprep.mubr.msk.bf16.mxu1 %vm2150_vm1, %v2149_v17 }
 0x325   : > { %v943_v36 = vpop.permute.xlu0 %942 }
 0x326   : > { %v948_v37 = vsel %vm894_vm3, %v943_v36, 0 }
 0x327   : > { %1955 = vmatpush3.bf16.xpose.msra.mxu0 %v948_v37 }
 0x328   : > { %1966 = vmatprep.subr.bf16.mxu0 %v2149_v17 }
 0x329   : > { %v992_v38 = vpop.permute.xlu1 %991  ;;  %v1041_v40 = vpop.permute.xlu0 %1040 }
 0x32a   : > { %v997_v39 = vsel %vm894_vm3, %v992_v38, 0  ;;  %v1046_v41 = vsel %vm894_vm3, %v1041_v40, 0 }
 0x32b   : > { %1961 = vmatpush3.bf16.xpose.msra.mxu1 %v997_v39 }
 0x32c   : > { %1972 = vmatprep.subr.bf16.mxu1 %v2149_v17 }
 0x32e   : > { %1957 = vmatmul.mubr.msk.bf16.vlgmr.msra.gmra.mrb[4].mxu0 %vm894_vm3, %v881_v30 }
 0x32f   : > { %1967 = vmatpush3.bf16.xpose.msra.mxu0 %v1046_v41  ;;  %1968 = vmatprep.mubr.msk.bf16.mxu0 %vm2150_vm1, %v2149_v17 }
 0x330   : > { %1978 = vmatprep.subr.bf16.mxu0 %v2149_v17 }
 0x332   : > { %1963 = vmatmul.mubr.msk.bf16.vlgmr.msra.gmra.mrb[4].mxu1 %vm894_vm3, %v2386_v34 }
 0x333   : > { %1974 = vmatprep.mubr.msk.bf16.mxu1 %vm2150_vm1, %v2149_v17 }
 0x336   : > { %1969 = vmatmul.mubr.msk.bf16.vlgmr.msra.gmra.mrb[8].mxu0 %vm894_vm3, %v2384_v33 }
 0x337   : > { %1980 = vmatprep.mubr.msk.bf16.mxu0 %vm2150_vm1, %v2149_v17 }
 0x390   : > { %v935_v43 = vpop.f32.mrb[0].mxu1 }
 0x391   : > { %v936_v44 = vadd.f32 %v1877_v42, %v935_v43  ;;  %v1952_v45 = vpop.f32.mrb[1].mxu1 }
 0x392   : > { %v938_v46 = vpop.f32.mrb[2].mxu1 }
 0x393   : > { %v1953_v47 = vpop.f32.mrb[3].mxu1  ;;  %v1088_v48 = vsel %vm894_vm3, %v936_v44, -inf }
 0x394   : > { %1089 = vmax.xlane.f32.xlu1 %v1088_v48 }
 0x401   : > { %v984_v49 = vpop.f32.mrb[4].mxu0 }
 0x402   : > { %v985_v50 = vadd.f32 %v1877_v42, %v984_v49  ;;  %v1958_v51 = vpop.f32.mrb[5].mxu0 }
 0x403   : > { %v987_v52 = vpop.f32.mrb[6].mxu0 }
 0x404   : > { %v1959_v53 = vpop.f32.mrb[7].mxu0  ;;  %v1091_v54 = vsel %vm894_vm3, %v985_v50, -inf }
 0x405   : > { %v1033_v55 = vpop.f32.mrb[4].mxu1  ;;  %1092 = vmax.xlane.f32.xlu0 %v1091_v54  ;;  %v2079_v53 = vld [vmem:[%s2304_s30] sm:$0xff]   ;;  %v2080_v54 = vld [vmem:[%s2304_s30 + $0x8] sm:$0xff]  }
 0x406   : > { %v1034_v56 = vadd.f32 %v1877_v42, %v1033_v55  ;;  %v1964_v57 = vpop.f32.mrb[5].mxu1 }
 0x407   : > { %v1036_v58 = vpop.f32.mrb[6].mxu1 }
 0x408   : > { %v1965_v59 = vpop.f32.mrb[7].mxu1  ;;  %v1094_v60 = vsel %vm894_vm3, %v1034_v56, -inf }
 0x409   : > { %1095 = vmax.xlane.f32.xlu0 %v1094_v60  ;;  %v1082_v61 = vpop.f32.mrb[8].mxu0 }
 0x40a   : > { %v1083_v62 = vadd.f32 %v1877_v42, %v1082_v61  ;;  %v1970_v63 = vpop.f32.mrb[9].mxu0 }
 0x40b   : > { %v1085_v0 = vpop.f32.mrb[10].mxu0 }
 0x40c   : > { %v1971_v1 = vpop.f32.mrb[11].mxu0  ;;  %v1097_v2 = vsel %vm894_vm3, %v1083_v62, -inf }
 0x40d   : > { %1098 = vmax.xlane.f32.xlu1 %v1097_v2 }
 0x41e   : > { %1185 = vrot.lane.b32.xlu1 %v881_v30, %s2155_s6 }
 0x41f   : > { %1136 = vrot.lane.b32.xlu0 %v2381_v27, %s2155_s6 }
 0x421   : > { %v1090_v3 = vpop.xlane.xlu1 %1089 }
 0x422   : > { %v1100_v4 = vsub.f32 %v936_v44, %v1090_v3 }
 0x424   : > { %v1104_v5 = vmul.f32 1.442695, %v1100_v4 }
 0x426   : > { %2087 = vpow2.f32 %v1104_v5 }
 0x430   : > { %v2088_v6 = vpop.eup %2087 }
 0x431   : > { %v1112_v7 = vsel %vm894_vm3, %v2088_v6, 0.0 }
 0x43e   : > { %1113 = vadd.xlane.f32.xlu0 %v1112_v7 }
 0x492   : > { %v1093_v8 = vpop.xlane.xlu0 %1092 }
 0x493   : > { %v1101_v9 = vsub.f32 %v985_v50, %v1093_v8 }
 0x495   : > { %v1106_v10 = vmul.f32 1.442695, %v1101_v9 }
 0x496   : > { %v1096_v11 = vpop.xlane.xlu0 %1095 }
 0x497   : > { %2089 = vpow2.f32 %v1106_v10  ;;  %v1102_v12 = vsub.f32 %v1034_v56, %v1096_v11  ;;  %v1886_v10 = vld [vmem:[%s2589_s25] ss:$0 sm:$0xff] }
 0x499   : > { %v1108_v13 = vmul.f32 1.442695, %v1102_v12 }
 0x49a   : > { %v1137_v14 = vpop.permute.xlu0 %1136  ;;  %v1099_v15 = vpop.xlane.xlu1 %1098 }
 0x49b   : > { %2091 = vpow2.f32 %v1108_v13  ;;  %v1143_v16 = vsel %vm1141_vm4, %v1137_v14, 0  ;;  %v1103_v18 = vsub.f32 %v1083_v62, %v1099_v15 }
 0x49c   : > { %1973 = vmatpush3.bf16.msra.mxu1 %v1143_v16 }
 0x49d   : > { %v1110_v20 = vmul.f32 1.442695, %v1103_v18  ;;  %1984 = vmatprep.subr.bf16.mxu1 %v2149_v17 }
 0x49e   : > { %v1186_v21 = vpop.permute.xlu1 %1185 }
 0x49f   : > { %2093 = vpow2.f32 %v1110_v20  ;;  %v1191_v22 = vsel %vm1141_vm4, %v1186_v21, 0 }
 0x4a0   : > { %1979 = vmatpush3.bf16.msra.mxu0 %v1191_v22 }
 0x4a1   : > { %v2090_v23 = vpop.eup %2089  ;;  %1990 = vmatprep.subr.bf16.mxu0 %v2149_v17 }
 0x4a2   : > { %v1115_v24 = vsel %vm894_vm3, %v2090_v23, 0.0 }
 0x4a3   : > { %1116 = vadd.xlane.f32.xlu1 %v1115_v24 }
 0x4a5   : > { %v2092_v25 = vpop.eup %2091 }
 0x4a6   : > { %v1118_v26 = vsel %vm894_vm3, %v2092_v25, 0.0 }
 0x4a7   : > { %1119 = vadd.xlane.f32.xlu0 %v1118_v26  ;;  %v2082_v26 = vld [vmem:[%s2321_s3 + $0x8] sm:$0xff]  }
 0x4a9   : > { %v2094_v27 = vpop.eup %2093 }
 0x4aa   : > { %v1121_v28 = vsel %vm894_vm3, %v2094_v27, 0.0 }
 0x4ab   : > { %1122 = vadd.xlane.f32.xlu1 %v1121_v28 }
 0x4bc   : > { %1233 = vrot.lane.b32.xlu1 %v2386_v34, %s2155_s6 }
 0x4bd   : > { %1281 = vrot.lane.b32.xlu0 %v2384_v33, %s2155_s6 }
 0x4cb   : > { %v1114_v29 = vpop.xlane.xlu0 %1113 }
 0x4cc   : > { %2095 = vrcp.f32 %v1114_v29 }
 0x4d6   : > { %v2096_v30 = vpop.eup %2095 }
 0x4d7   : > { %v1128_v31 = vmul.f32 %v2096_v30, %v2088_v6  ;;  %v1890_v30 = vld [vmem:[%s2590_s19] ss:$0 sm:$0xff] }
 0x4d9   : > { %v1132_v32 = vpack.c.bf16 %v1128_v31, %v1128_v31 }
 0x4db   : > { %1975 = vmatmul.mubr.msk.bf16.vlgmr.msra.gmra.mrb[8].mxu1 %vm894_vm3, %v1132_v32 }
 0x4dc   : > { %1986 = vmatprep.mubr.msk.bf16.mxu1 %vm2150_vm1, %v2149_v17 }
 0x530   : > { %v1117_v35 = vpop.xlane.xlu1 %1116 }
 0x531   : > { %2097 = vrcp.f32 %v1117_v35 }
 0x534   : > { %v1120_v36 = vpop.xlane.xlu0 %1119 }
 0x535   : > { %2099 = vrcp.f32 %v1120_v36 }
 0x538   : > { %v1123_v37 = vpop.xlane.xlu1 %1122  ;;  %v1282_v33 = vpop.permute.xlu0 %1281 }
 0x539   : > { %2101 = vrcp.f32 %v1123_v37  ;;  %v1287_v44 = vsel %vm1141_vm4, %v1282_v33, 0  ;;  %v2086_v33 = vld [vmem:[%s2335_s20 + $0x18] sm:$0xff]  }
 0x53b   : > { %v2098_v34 = vpop.eup %2097 }
 0x53c   : > { %v1129_v38 = vmul.f32 %v2098_v34, %v2090_v23  ;;  %v1234_v39 = vpop.permute.xlu1 %1233  ;;  %v2083_v34 = vld [vmem:[%s2335_s20] sm:$0xff]  }
 0x53d   : > { %v1239_v40 = vsel %vm1141_vm4, %v1234_v39, 0  ;;  %v2085_v39 = vld [vmem:[%s2335_s20 + $0x10] sm:$0xff]  }
 0x53e   : > { %1985 = vmatpush3.bf16.msra.mxu1 %v1239_v40  ;;  %v1133_v41 = vpack.c.bf16 %v1129_v38, %v1129_v38  ;;  %v2084_v38 = vld [vmem:[%s2335_s20 + $0x8] sm:$0xff]   ;;  %v1892_v40 = vld [vmem:[%s2594_s4] ss:$0 sm:$0xff] }
 0x53f   : > { %v2100_v42 = vpop.eup %2099  ;;  %1996 = vmatprep.subr.bf16.mxu1 %v2149_v17 }
 0x540   : > { %v1130_v43 = vmul.f32 %v2100_v42, %v2092_v25  ;;  %1981 = vmatmul.mubr.msk.bf16.vlgmr.msra.gmra.mrb[12].mxu0 %vm894_vm3, %v1133_v41  ;;  %v2081_v25 = vld [vmem:[%s2321_s3] sm:$0xff]   ;;  %s2591_s3 = sld [smem:[#allocation15_spill]] }
 0x541   : > { %1991 = vmatpush3.bf16.msra.mxu0 %v1287_v44  ;;  %1992 = vmatprep.mubr.msk.bf16.mxu0 %vm2150_vm1, %v2149_v17 }
 0x542   : > { %v1134_v45 = vpack.c.bf16 %v1130_v43, %v1130_v43  ;;  %2004 = vmatprep.subr.bf16.mxu0 %v2149_v17 }
 0x543   : > { %v2102_v46 = vpop.eup %2101 }
 0x544   : > { %v1131_v47 = vmul.f32 %v2102_v46, %v2094_v27  ;;  %1987 = vmatmul.mubr.msk.bf16.vlgmr.msra.gmra.mrb[12].mxu1 %vm894_vm3, %v1134_v45 }
 0x545   : > { %2000 = vmatprep.mubr.msk.bf16.mxu1 %vm2150_vm1, %v2149_v17  ;;  %1997 = vmatpush3.bf16.msra.mxu1 %v2079_v53 }
 0x546   : > { %v1135_v48 = vpack.c.bf16 %v1131_v47, %v1131_v47  ;;  %1998 = vmatprep.subr.bf16.mxu1 %v2149_v17  ;;  %s2592_s26 = scalar_lea.vmem %s2591_s3, %s2281_s28 }
 0x547   : > { %v1891_v32 = vld [vmem:[%s2592_s26] ss:$0 sm:$0xff] }
 0x548   : > { %1993 = vmatmul.mubr.msk.bf16.vlgmr.msra.gmra.mrb[16].mxu0 %vm894_vm3, %v1135_v48 }
 0x549   : > { %2008 = vmatprep.mubr.msk.bf16.mxu0 %vm2150_vm1, %v2149_v17  ;;  %1999 = vmatpush3.bf16.msra.mxu1 %v2080_v54 }
 0x54a   : > { %2012 = vmatprep.subr.bf16.mxu1 %v2149_v17  ;;  %2005 = vmatpush3.bf16.msra.mxu0 %v2081_v25 }
 0x54b   : > { %2006 = vmatprep.subr.bf16.mxu0 %v2149_v17 }
 0x54e   : > { %2007 = vmatpush3.bf16.msra.mxu0 %v2082_v26 }
 0x5ae   : > { %v1179_v49 = vpop.f32.mrb[8].mxu1 }
 0x5af   : > { %v1976_v50 = vpop.f32.mrb[9].mxu1 }
 0x5b0   : > { %v1182_v51 = vpop.f32.mrb[10].mxu1 }
 0x5b1   : > { %v1977_v52 = vpop.f32.mrb[11].mxu1 }
 0x613   : > { %v1227_v55 = vpop.f32.mrb[12].mxu0 }
 0x614   : > { %1330 = vrot.lane.b32.xlu1 %v1227_v55, %s2156_s9  ;;  %v1982_v56 = vpop.f32.mrb[13].mxu0  ;;  %v1896_v55 = vld [vmem:[%s747_s18] ss:$0 sm:$0xff] }
 0x615   : > { %v1230_v57 = vpop.f32.mrb[14].mxu0 }
 0x616   : > { %v1983_v58 = vpop.f32.mrb[15].mxu0 }
 0x617   : > { %v1275_v59 = vpop.f32.mrb[12].mxu1 }
 0x618   : > { %1334 = vrot.lane.b32.xlu0 %v1275_v59, %s2157_s21  ;;  %v1988_v60 = vpop.f32.mrb[13].mxu1 }
 0x619   : > { %v1278_v61 = vpop.f32.mrb[14].mxu1 }
 0x61a   : > { %v1989_v62 = vpop.f32.mrb[15].mxu1 }
 0x61b   : > { %v1323_v63 = vpop.f32.mrb[16].mxu0 }
 0x61c   : > { %1338 = vrot.lane.b32.xlu1 %v1323_v63, %s2158_s27  ;;  %v1994_v0 = vpop.f32.mrb[17].mxu0 }
 0x61d   : > { %v1326_v1 = vpop.f32.mrb[18].mxu0 }
 0x61e   : > { %v1995_v2 = vpop.f32.mrb[19].mxu0 }
 0x686   : > { %v1331_v3 = vpop.permute.xlu1 %1330 }
 0x687   : > { %v1341_v5 = vsel %vm894_vm3, %v1179_v49, %v1331_v3 }
 0x68a   : > { %v1335_v4 = vpop.permute.xlu0 %1334 }
 0x68b   : > { %v1343_v6 = vsel %vm1342_vm5, %v1341_v5, %v1335_v4 }
 0x68e   : > { %v1339_v7 = vpop.permute.xlu1 %1338 }
 0x68f   : > { %v1345_v8 = vsel %vm1344_vm6, %v1343_v6, %v1339_v7 }
 0x690   : > { %v1346_v9 = vpack.c.bf16 %v1345_v8, %v1345_v8  ;;  %v1902_v8 = vld [vmem:[%s750_s1] ss:$0 sm:$0xff]  ;;  %s2159_s1 = smov 32  }
 0x692   : > { %2001 = vmatmul.mubr.msk.bf16.vlgmr.msra.gmra.mrb[16].mxu1 %vm826_vm2, %v1346_v9 }
 0x693   : > { %2020 = vmatprep.mubr.msk.bf16.mxu1 %vm2150_vm1, %v2149_v17  ;;  %2013 = vmatpush3.bf16.msra.mxu1 %v2083_v34 }
 0x694   : > { %2014 = vmatprep.subr.bf16.mxu1 %v2149_v17 }
 0x697   : > { %2015 = vmatpush3.bf16.msra.mxu1 %v2084_v38 }
 0x698   : > { %2016 = vmatprep.subr.bf16.mxu1 %v2149_v17 }
 0x69b   : > { %2017 = vmatpush3.bf16.msra.mxu1 %v2085_v39 }
 0x69c   : > { %2018 = vmatprep.subr.bf16.mxu1 %v2149_v17 }
 0x69f   : > { %2019 = vmatpush3.bf16.msra.mxu1 %v2086_v33 }
 0x765   : > { %v1407_v11 = vpop.f32.mrb[16].mxu1 }
 0x766   : > { %v1408_v12 = vadd.f32 %v1886_v10, %v1407_v11  ;;  %v2002_v13 = vpop.f32.mrb[17].mxu1  ;;  %v1903_v10 = vld [vmem:[%s753_s10] ss:$0 sm:$0xff] }
 0x767   : > { %v1410_v14 = vpop.f32.mrb[18].mxu1 }
 0x768   : > { %v2003_v15 = vpop.f32.mrb[19].mxu1  ;;  %v1413_v16 = vadd.f32 %v1408_v12, %v2365_v19 }
 0x76a   : > { %v1416_v18 = vsel %vm826_vm2, %v1413_v16, 0.0 }
 0x76b   : > { %1417 = vadd.xlane.f32.xlu0 %v1416_v18 }
 0x7f8   : > { %v1418_v20 = vpop.xlane.xlu0 %1417 }
 0x7f9   : > { %v1420_v21 = vmul.f32 0.03125, %v1418_v20 }
 0x7fb   : > { %v1421_v22 = vsub.f32 %v1413_v16, %v1420_v21 }
 0x7fd   : > { %v1422_v23 = vmul.f32 %v1421_v22, %v1421_v22 }
 0x7ff   : > { %v1423_v24 = vsel %vm826_vm2, %v1422_v23, 0.0 }
 0x800   : > { %1424 = vadd.xlane.f32.xlu1 %v1423_v24 }
 0x88d   : > { %v1425_v19 = vpop.xlane.xlu1 %1424 }
 0x88e   : > { %v1426_v27 = vmul.f32 0.03125, %v1425_v19 }
 0x890   : > { %v1427_v28 = vadd.f32 1e-12, %v1426_v27 }
 0x892   : > { %2103 = vrsqrt.f32 %v1427_v28 }
 0x89c   : > { %v2104_v29 = vpop.eup %2103 }
 0x89d   : > { %v1429_v31 = vmul.f32 %v2104_v29, %v1421_v22 }
 0x89f   : > { %v1436_v35 = vmul.f32 %v1890_v30, %v1429_v31 }
 0x8a1   : > { %v1443_v36 = vadd.f32 %v1891_v32, %v1436_v35 }
 0x8a3   : > { %v1444_v37 = vpack.c.bf16 %v1443_v36, %v1443_v36 }
 0x8a5   : > { %2009 = vmatmul.mubr.msk.bf16.vlgmr.msra.gmra.mrb[20].mxu0 %vm826_vm2, %v1444_v37 }
 0x978   : > { %v1505_v41 = vpop.f32.mrb[20].mxu0 }
 0x979   : > { %v1506_v42 = vadd.f32 %v1892_v40, %v1505_v41  ;;  %v2010_v43 = vpop.f32.mrb[21].mxu0 }
 0x97a   : > { %v1508_v44 = vpop.f32.mrb[22].mxu0 }
 0x97b   : > { %v1511_v45 = vmul.f32 %v1506_v42, %v1506_v42  ;;  %v2011_v46 = vpop.f32.mrb[23].mxu0 }
 0x97d   : > { %v1512_v47 = vmul.f32 %v1511_v45, %v1506_v42 }
 0x97f   : > { %v1513_v48 = vmul.f32 0.044715, %v1512_v47 }
 0x981   : > { %v1514_v49 = vadd.f32 %v1513_v48, %v1506_v42 }
 0x983   : > { %v1515_v50 = vmul.f32 0.7978846, %v1514_v49 }
 0x985   : > { %2105 = vtanh.f32 %v1515_v50 }
 0x98f   : > { %v2106_v17 = vpop.eup %2105 }
 0x990   : > { %v1517_v51 = vadd.f32 1.0, %v2106_v17 }
 0x992   : > { %v1518_v52 = vmul.f32 0.5, %v1517_v51 }
 0x994   : > { %v1519_v53 = vmul.f32 %v1518_v52, %v1506_v42 }
 0x996   : > { %v1520_v54 = vpack.c.bf16 %v1519_v53, %v1519_v53 }
 0x998   : > { %2021 = vmatmul.mubr.msk.bf16.vlgmr.msra.gmra.mrb[20].mxu1 %vm1560_vm7, %v1520_v54 }
 0xa6b   : > { %v1598_v56 = vpop.f32.mrb[20].mxu1 }
 0xa6c   : > { %v1599_v57 = vadd.f32 %v1896_v55, %v1598_v56  ;;  %v2022_v58 = vpop.f32.mrb[21].mxu1 }
 0xa6d   : > { %v1601_v59 = vpop.f32.mrb[22].mxu1 }
 0xa6e   : > { %v2023_v60 = vpop.f32.mrb[23].mxu1  ;;  %v1604_v61 = vadd.f32 %v1599_v57, %v1443_v36 }
 0xa70   : > { %v1607_v62 = vsel %vm826_vm2, %v1604_v61, 0.0 }
 0xa71   : > { %1608 = vadd.xlane.f32.xlu0 %v1607_v62 }
 0xafe   : > { %v1609_v63 = vpop.xlane.xlu0 %1608 }
 0xaff   : > { %v1610_v0 = vmul.f32 0.03125, %v1609_v63 }
 0xb01   : > { %v1611_v1 = vsub.f32 %v1604_v61, %v1610_v0 }
 0xb03   : > { %v1612_v2 = vmul.f32 %v1611_v1, %v1611_v1 }
 0xb05   : > { %v1613_v3 = vsel %vm826_vm2, %v1612_v2, 0.0 }
 0xb06   : > { %1614 = vadd.xlane.f32.xlu0 %v1613_v3 }
 0xb93   : > { %v1615_v4 = vpop.xlane.xlu0 %1614 }
 0xb94   : > { %v1616_v5 = vmul.f32 0.03125, %v1615_v4 }
 0xb96   : > { %v1617_v6 = vadd.f32 1e-12, %v1616_v5 }
 0xb98   : > { %2107 = vrsqrt.f32 %v1617_v6 }
 0xba2   : > { %v2108_v7 = vpop.eup %2107 }
 0xba3   : > { %v1619_v9 = vmul.f32 %v2108_v7, %v1611_v1 }
 0xba5   : > { %v1626_v11 = vmul.f32 %v1902_v8, %v1619_v9 }
 0xba7   : > { %v1633_v12 = vadd.f32 %v1903_v10, %v1626_v11 }
 0xba9   : > { %v1644_v13 = vsel %vm826_vm2, %v1633_v12, -inf  ;;  %1634 = vst.msk [vmem:[#allocation2] sm:$0xff] %vm826_vm2, %v1633_v12  ;;  %v1635_v22 = vsel %vm826_vm2, %v1633_v12, 0.0 }
 0xbaa   : > { %v1645_v14 = vrot.slane %v1644_v13, 4  ;;  %v1636_v23 = vrot.slane %v1635_v22, 4 }
 0xbac   : > { %v1646_v15 = vmax.f32 %v1644_v13, %v1645_v14  ;;  %v1637_v24 = vadd.f32 %v1636_v23, %v1635_v22 }
 0xbae   : > { %v1647_v16 = vrot.slane %v1646_v15, 2  ;;  %v1638_v25 = vrot.slane %v1637_v24, 2 }
 0xbb0   : > { %v1648_v18 = vmax.f32 %v1646_v15, %v1647_v16  ;;  %v1639_v26 = vadd.f32 %v1638_v25, %v1637_v24 }
 0xbb2   : > { %v1649_v20 = vrot.slane %v1648_v18, 1  ;;  %v1640_v19 = vrot.slane %v1639_v26, 1 }
 0xbb4   : > { %v1650_v21 = vmax.f32 %v1648_v18, %v1649_v20  ;;  %v1641_v27 = vadd.f32 %v1640_v19, %v1639_v26 }
 0xbb6   : > { %1652 = vrot.lane.b32.xlu1 %v1650_v21, %s2159_s1  ;;  %v1643_v28 = vmul.f32 0.125, %v1641_v27 }
 0xc28   : > { %v1653_v29 = vpop.permute.xlu1 %1652 }
 0xc29   : > { %v1655_v30 = vsel %vm826_vm2, %v1643_v28, %v1653_v29 }
 0xc2a   : > { %1657 = vst.msk [vmem:[%s757_s11] sm:$0x1] %vm1656_vm8, %v1655_v30 }
 0xc2b PF: > { %s2597_s25 = sld [smem:[#allocation6_spill]]  ;;  %s2598_s21 = sld [smem:[#allocation4_spill]] }
 0xc2c   : > { %s2599_s22 = sld [smem:[#allocation5_spill]]  ;;  %s2600_s23 = sld [smem:[#allocation7_spill]] }
 0xc2d   : > { %s2601_s24 = sld [smem:[#allocation8_spill]] }
 0xc31   : > { %s26_s25 = sadd.s32 1, %s2597_s25  }
 0xc32   : > { %p23_p8 = scmp.ge.s32.totalorder %s26_s25, 6  }
 0xc34   :  { %25 = sbr.rel (!%p23_p8) target bundleno = 12 (0xc), region = 159 }

</bundles_post_ra>
